<compile_context>
chip_gen: v7x
topology: tpu7x:2x2x1
jax: 0.10.0
libtpu: 0.0.40
codegen_flags: <defaults>
</compile_context>

<pallas_src>
import functools

import jax
import jax.numpy as jnp
from jax.experimental import pallas as pl
from jax.experimental.pallas import tpu as pltpu

LANE = 128     # vreg lane width
SUBLANE = 8    # f32 sublane count


def _round_up(x, m):
    return ((x + m - 1) // m) * m


def mlp_softmax_kernel(x_ref, w1_ref, b1_ref, w2_ref, b2_ref, o_ref, *, matmul_dtype):
    # Hidden layer: Linear + ReLU (MXU matmul, f32 accumulate).
    x = x_ref[...].astype(matmul_dtype)
    h = jnp.dot(x, w1_ref[...].astype(matmul_dtype),
                preferred_element_type=jnp.float32) + b1_ref[...]
    h = jnp.maximum(h, 0.0)

    # Output layer: Linear (N is lane-padded to 128; pad columns carry -1e30 bias).
    s = jnp.dot(h.astype(matmul_dtype), w2_ref[...].astype(matmul_dtype),
                preferred_element_type=jnp.float32) + b2_ref[...]

    # Numerically-stable softmax over the last (action) axis.
    # Padded lanes: s - max ~ -1e30 -> exp underflows to 0, so they do not
    # pollute the denominator.
    s = s - jnp.max(s, axis=-1, keepdims=True)
    e = jnp.exp(s)
    inv = pl.reciprocal(jnp.sum(e, axis=-1, keepdims=True), approx=True)  # EUP slot
    o_ref[...] = (e * inv).astype(o_ref.dtype)


def network_forward(x, w1, b1, w2, b2, *, block_b=128, use_bf16_matmul=False):
    """x: [B, num_inputs]; w1: [num_inputs, H]; b1: [1, H];
    w2: [H, num_actions]; b2: [1, num_actions]  ->  [B, num_actions] probs."""
    B, NI = x.shape
    H = w1.shape[1]
    NA = w2.shape[1]
    assert w1.shape == (NI, H) and b1.shape == (1, H)
    assert w2.shape == (H, NA) and b2.shape == (1, NA)

    # --- lane-dense padding of hidden / action axes (wrapper-side layout plumbing) ---
    Hp = _round_up(H, LANE)
    NAp = _round_up(NA, LANE)
    w1p = jnp.pad(w1, ((0, 0), (0, Hp - H)))
    b1p = jnp.pad(b1, ((0, 0), (0, Hp - H)))   # relu(0 + 0) = 0 -> padded hidden units are dead
    w2p = jnp.pad(w2, ((0, Hp - H), (0, NAp - NA)))
    # Padded action logits get a huge negative bias so exp() underflows to 0.
    b2p = jnp.pad(b2, ((0, 0), (0, NAp - NA)), constant_values=-1e30)

    # --- batch tiling (TB multiple of 8; pad B up to a whole number of tiles) ---
    TB = min(block_b, _round_up(B, SUBLANE))
    TB = _round_up(TB, SUBLANE)
    Bp = _round_up(B, TB)
    xp = jnp.pad(x, ((0, Bp - B), (0, 0)))
    grid = (Bp // TB,)

    matmul_dtype = jnp.bfloat16 if use_bf16_matmul else jnp.float32
    kernel = functools.partial(mlp_softmax_kernel, matmul_dtype=matmul_dtype)

    # Advisory cost hint for XLA's scheduler around the custom call.
    flops = 2 * Bp * (NI * Hp + Hp * NAp)
    transcendentals = Bp * (NAp + 1)                       # exp + reciprocal
    bytes_accessed = 4 * (Bp * NI + Bp * NAp + NI * Hp + Hp * NAp + Hp + NAp)

    out = pl.pallas_call(
        kernel,
        out_shape=jax.ShapeDtypeStruct((Bp, NAp), jnp.float32),
        grid=grid,
        in_specs=[
            pl.BlockSpec((TB, NI), lambda i: (i, 0)),      # x: tiled over batch (pipelined)
            pl.BlockSpec((NI, Hp), lambda i: (0, 0)),      # weights/biases: VMEM-resident
            pl.BlockSpec((1, Hp), lambda i: (0, 0)),
            pl.BlockSpec((Hp, NAp), lambda i: (0, 0)),
            pl.BlockSpec((1, NAp), lambda i: (0, 0)),
        ],
        out_specs=pl.BlockSpec((TB, NAp), lambda i: (i, 0)),  # lane-dense (TB,128) stores
        compiler_params=pltpu.CompilerParams(
            dimension_semantics=("parallel",),             # megacore sharding on v7x
            vmem_limit_bytes=32 * 1024 * 1024,             # fits v5e/v6e/v7x scoped VMEM
        ),
        cost_estimate=pl.CostEstimate(
            flops=flops, transcendentals=transcendentals, bytes_accessed=bytes_accessed),
    )(xp, w1p, b1p, w2p, b2p)

    # Slice away batch padding and padded action lanes.
    return out[:B, :NA]


def init_params(key, num_inputs, hidden_size, num_actions):
    """Deterministic synthetic parameters (PyTorch-like uniform fan-in init)."""
    k1, k2, k3, k4 = jax.random.split(key, 4)
    bound1 = 1.0 / jnp.sqrt(num_inputs)
    bound2 = 1.0 / jnp.sqrt(hidden_size)
    w1 = jax.random.uniform(k1, (num_inputs, hidden_size), jnp.float32, -bound1, bound1)
    b1 = jax.random.uniform(k2, (1, hidden_size), jnp.float32, -bound1, bound1)
    w2 = jax.random.uniform(k3, (hidden_size, num_actions), jnp.float32, -bound2, bound2)
    b2 = jax.random.uniform(k4, (1, num_actions), jnp.float32, -bound2, bound2)
    return w1, b1, w2, b2


def reference_forward(x, w1, b1, w2, b2):
    h = jnp.maximum(x @ w1 + b1, 0.0)
    return jax.nn.softmax(h @ w2 + b2, axis=-1)


if __name__ == "__main__":
    num_inputs, hidden_size, num_actions = 16, 32, 4

    key = jax.random.PRNGKey(0)
    kx1, kx2, kp = jax.random.split(key, 3)
    w1, b1, w2, b2 = init_params(kp, num_inputs, hidden_size, num_actions)

    # Case 1: batch that spans multiple grid steps (256 rows, TB=128 -> 2 steps).
    x_big = jax.random.normal(kx1, (256, num_inputs), jnp.float32)
    out_big = jax.block_until_ready(network_forward(x_big, w1, b1, w2, b2, block_b=128))

    # Case 2: small ragged batch exercising batch padding (10 rows -> padded to 16).
    x_small = jax.random.normal(kx2, (10, num_inputs), jnp.float32)
    out_small = jax.block_until_ready(network_forward(x_small, w1, b1, w2, b2, block_b=128))

    # Reference checks in plain JAX (approx EUP reciprocal -> loosen tolerance slightly).
    ref_big = reference_forward(x_big, w1, b1, w2, b2)
    ref_small = reference_forward(x_small, w1, b1, w2, b2)

    assert out_big.shape == (256, num_actions)
    assert out_small.shape == (10, num_actions)
    assert jnp.allclose(out_big, ref_big, atol=2e-3), "mismatch vs reference (big batch)"
    assert jnp.allclose(out_small, ref_small, atol=2e-3), "mismatch vs reference (small batch)"
    assert jnp.allclose(jnp.sum(out_big, axis=-1), 1.0, atol=5e-3)
    assert jnp.allclose(jnp.sum(out_small, axis=-1), 1.0, atol=5e-3)

    print("KERNEL_OK")
</pallas_src>

<mosaic_0001>
module attributes {stable_mosaic.version = 11 : i64} {
  func.func @mlp_softmax_kernel(%arg0: i32, %arg1: memref<128x16xf32, #tpu.memory_space<vmem>>, %arg2: memref<16x128xf32, #tpu.memory_space<vmem>>, %arg3: memref<1x128xf32, #tpu.memory_space<vmem>>, %arg4: memref<128x128xf32, #tpu.memory_space<vmem>>, %arg5: memref<1x128xf32, #tpu.memory_space<vmem>>, %arg6: memref<128x128xf32, #tpu.memory_space<vmem>>) attributes {dimension_semantics = [#tpu.dimension_semantics<parallel>], iteration_bounds = array<i64: 2>, scalar_prefetch = 0 : i64, scratch_operands = 0 : i64, tpu.core_type = #tpu.core_type<tc>, window_params = [{transform_indices = @transform_0, window_bounds = array<i64: 128, 16>}, {pipeline_mode = #tpu.pipeline_mode<synchronous>, transform_indices = @transform_1, window_bounds = array<i64: 16, 128>}, {pipeline_mode = #tpu.pipeline_mode<synchronous>, transform_indices = @transform_2, window_bounds = array<i64: 1, 128>}, {pipeline_mode = #tpu.pipeline_mode<synchronous>, transform_indices = @transform_3, window_bounds = array<i64: 128, 128>}, {pipeline_mode = #tpu.pipeline_mode<synchronous>, transform_indices = @transform_4, window_bounds = array<i64: 1, 128>}, {transform_indices = @transform_5, window_bounds = array<i64: 128, 128>}]} {
    %c0 = arith.constant 0 : index
    %c0_0 = arith.constant 0 : index
    %0 = vector.load %arg1[%c0, %c0_0] : memref<128x16xf32, #tpu.memory_space<vmem>>, vector<128x16xf32>
    %c0_1 = arith.constant 0 : index
    %c0_2 = arith.constant 0 : index
    %1 = vector.load %arg2[%c0_1, %c0_2] : memref<16x128xf32, #tpu.memory_space<vmem>>, vector<16x128xf32>
    %cst = arith.constant dense<0.000000e+00> : vector<128x128xf32>
    %2 = tpu.matmul %0, %1, %cst {dimension_numbers = #tpu.dot_dimension_numbers<[1], [0], [0], [1], [0, 0, 1, 1], [], []>} : vector<128x16xf32>, vector<16x128xf32>, vector<128x128xf32> -> vector<128x128xf32>
    %c0_3 = arith.constant 0 : index
    %c0_4 = arith.constant 0 : index
    %3 = vector.load %arg3[%c0_3, %c0_4] : memref<1x128xf32, #tpu.memory_space<vmem>>, vector<1x128xf32>
    %4 = vector.broadcast %3 : vector<1x128xf32> to vector<128x128xf32>
    %5 = arith.addf %2, %4 : vector<128x128xf32>
    %cst_5 = arith.constant 0.000000e+00 : f32
    %6 = vector.broadcast %cst_5 : f32 to vector<128x128xf32>
    %7 = arith.maximumf %5, %6 : vector<128x128xf32>
    %c0_6 = arith.constant 0 : index
    %c0_7 = arith.constant 0 : index
    %8 = vector.load %arg4[%c0_6, %c0_7] : memref<128x128xf32, #tpu.memory_space<vmem>>, vector<128x128xf32>
    %cst_8 = arith.constant dense<0.000000e+00> : vector<128x128xf32>
    %9 = tpu.matmul %7, %8, %cst_8 {dimension_numbers = #tpu.dot_dimension_numbers<[1], [0], [0], [1], [0, 0, 1, 1], [], []>} : vector<128x128xf32>, vector<128x128xf32>, vector<128x128xf32> -> vector<128x128xf32>
    %c0_9 = arith.constant 0 : index
    %c0_10 = arith.constant 0 : index
    %10 = vector.load %arg5[%c0_9, %c0_10] : memref<1x128xf32, #tpu.memory_space<vmem>>, vector<1x128xf32>
    %11 = vector.broadcast %10 : vector<1x128xf32> to vector<128x128xf32>
    %12 = arith.addf %9, %11 : vector<128x128xf32>
    %cst_11 = arith.constant dense<0xFF800000> : vector<128xf32>
    %13 = vector.multi_reduction <maximumf>, %12, %cst_11 [1] : vector<128x128xf32> to vector<128xf32>
    %14 = vector.shape_cast %13 : vector<128xf32> to vector<128x1xf32>
    %15 = vector.broadcast %14 : vector<128x1xf32> to vector<128x128xf32>
    %16 = arith.subf %12, %15 : vector<128x128xf32>
    %17 = math.exp %16 : vector<128x128xf32>
    %cst_12 = arith.constant dense<0.000000e+00> : vector<128xf32>
    %18 = vector.multi_reduction <add>, %17, %cst_12 [1] : vector<128x128xf32> to vector<128xf32>
    %19 = vector.shape_cast %18 : vector<128xf32> to vector<128x1xf32>
    %20 = tpu.reciprocal %19 {approx = true} : vector<128x1xf32> -> vector<128x1xf32>
    %21 = vector.broadcast %20 : vector<128x1xf32> to vector<128x128xf32>
    %22 = arith.mulf %17, %21 : vector<128x128xf32>
    %c0_13 = arith.constant 0 : index
    %c0_14 = arith.constant 0 : index
    %23 = vector.load %arg6[%c0_13, %c0_14] : memref<128x128xf32, #tpu.memory_space<vmem>>, vector<128x128xf32>
    tpu.vector_store %arg6[%c0_13, %c0_14], %22 {strides = array<i32>} : memref<128x128xf32, #tpu.memory_space<vmem>>, vector<128x128xf32>,
    return
  }
  func.func @transform_0(%arg0: i32) -> (i32, i32) {
    %c0_i32 = arith.constant 0 : i32
    %c0_i32_0 = arith.constant 0 : i32
    return %arg0, %c0_i32 : i32, i32
  }
  func.func @transform_1(%arg0: i32) -> (i32, i32) {
    %c0_i32 = arith.constant 0 : i32
    %c0_i32_0 = arith.constant 0 : i32
    %c0_i32_1 = arith.constant 0 : i32
    return %c0_i32, %c0_i32_0 : i32, i32
  }
  func.func @transform_2(%arg0: i32) -> (i32, i32) {
    %c0_i32 = arith.constant 0 : i32
    %c0_i32_0 = arith.constant 0 : i32
    %c0_i32_1 = arith.constant 0 : i32
    return %c0_i32, %c0_i32_0 : i32, i32
  }
  func.func @transform_3(%arg0: i32) -> (i32, i32) {
    %c0_i32 = arith.constant 0 : i32
    %c0_i32_0 = arith.constant 0 : i32
    %c0_i32_1 = arith.constant 0 : i32
    return %c0_i32, %c0_i32_0 : i32, i32
  }
  func.func @transform_4(%arg0: i32) -> (i32, i32) {
    %c0_i32 = arith.constant 0 : i32
    %c0_i32_0 = arith.constant 0 : i32
    %c0_i32_1 = arith.constant 0 : i32
    return %c0_i32, %c0_i32_0 : i32, i32
  }
  func.func @transform_5(%arg0: i32) -> (i32, i32) {
    %c0_i32 = arith.constant 0 : i32
    %c0_i32_0 = arith.constant 0 : i32
    return %arg0, %c0_i32 : i32, i32
  }
}

</mosaic_0001>

<bundles_post_ra>
// kernel: tpu_custom_call.1
= control target key start
LH: loop header
LB: loop body
LE: loop exit
PB: predicated region body
PF: predicated region fallthrough
CT: control target
= control target key end

     0   :  { %10 = vsyncpa [#allocation3], 0  ;;  %s1599_s0 = inlined_call_operand.vmem [shape: f32[256,16], index: 0, kind: input, shape index: {}]   ;;  %s1600_s1 = inlined_call_operand.vmem [shape: f32[16,128], index: 1, kind: input, shape index: {}]   ;;  %s1601_s2 = inlined_call_operand.vmem [shape: f32[1,128], index: 2, kind: input, shape index: {}]   ;;  %s1602_s3 = inlined_call_operand.vmem [shape: f32[128,128], index: 3, kind: input, shape index: {}]   ;;  %s1603_s4 = inlined_call_operand.vmem [shape: f32[1,128], index: 4, kind: input, shape index: {}]   ;;  %s1604_s5 = inlined_call_operand.hbm [shape: f32[256,128], index: 5, kind: output, shape index: {}]  }
   0x1   :  { %12 = vsyncpa [#allocation3 + $0x1], 0  ;;  %s1284_s18 = smov 0   ;;  %s1286_s19 = smov 0  }
   0x2   :  { %s1288_s20 = smov 0   ;;  %s1290_s21 = smov 0  }
   0x3 LB: > { %s1305_s22 = sadd.s32 4294967295, %s1249_s21   ;;  %s865_s23 = sadd.s32 4294967294, %s1249_s21   ;;  %s1249_s21 = sphi %s1290_s21, %s1610_s21   ;;  %s1245_s20 = sphi %s1288_s20, %s1609_s20   ;;  %s1241_s19 = sphi %s1286_s19, %s1608_s19   ;;  %s1237_s18 = sphi %s1284_s18, %s1607_s18  }
   0x4   : > { %s1309_s24 = sadd.s32 1, %s1249_s21   ;;  %s135_s25 = sadd.s32 1, %s1245_s20 }
   0x5   : > { %s132_s26 = ssub.s32 %s1249_s21, %s1309_s24  ;;  %p145_p0 = scmp.ne.s32.totalorder %s1245_s20, %s1241_s19 }
   0x6   : > { %p133_p1 = scmp.eq.s32.totalorder %s132_s26, 0  ;;  %p146_p2 = scmp.eq.s32.totalorder %s1305_s22, 1 }
   0x7   : > { %p151_p3 = scmp.ne.s32.totalorder %s1241_s19, %s1237_s18  ;;  %p152_p4 = scmp.eq.s32.totalorder %s865_s23, 1 }
   0x8   : > { %s1320_s27 = scalar_select %p133_p1, %s1245_s20, %s135_s25  }
   0x9   : > { %p1322_p5 = por %p146_p2, %p145_p0  ;;  %p1326_p6 = por %p152_p4, %p151_p3 }
   0xa   : > { %p868_p7 = scmp.ge.s32.totalorder %s1249_s21, 1  ;;  %p191_p8 = scmp.lt.s32.totalorder %s1249_s21, 3 }
   0xc   : > { %p192_p9 = pnand %p868_p7, %p191_p8 }
   0xd   : > { %v242_v0 = vld [vmem:[%s1600_s1] sm:$0xff] (!%p192_p9)  ;;  %v243_v1 = vld [vmem:[%s1600_s1 + $0x8] sm:$0xff] (!%p192_p9)  ;;  %s870_s9 = sshll.u32 (!%p192_p9), %s1305_s22, 4  ;;  %v463_v5 = vld [vmem:[%s1602_s3 + $0x10] sm:$0xff] (!%p192_p9)  ;;  %vm251_vm0 = vcmask (!%p192_p9), 130048   ;;  %s895_s6 = sshll.u32 (!%p192_p9), %s1305_s22, 11 }
   0xe   : > { %195 = sbr.rel (%p192_p9) target bundleno = 818 (0x332), region = 40  ;;  %v461_v2 = vld [vmem:[%s1602_s3] sm:$0xff] (!%p192_p9)  ;;  %v1030_v3 = vpack.c.bf16 (!%p192_p9), %v243_v1, %v242_v0  ;;  %p220_p10 = scmp.lt.s32.totalorder (!%p192_p9), %s870_s9, 31  ;;  %v462_v4 = vld [vmem:[%s1602_s3 + $0x8] sm:$0xff] (!%p192_p9)  ;;  %v464_v6 = vld [vmem:[%s1602_s3 + $0x18] sm:$0xff] (!%p192_p9) }
   0xf   : > { %v1034_v7 = vpack.c.bf16 (!%p192_p9), %v462_v4, %v461_v2  ;;  %v1038_v8 = vpack.c.bf16 (!%p192_p9), %v464_v6, %v463_v5  ;;  %v465_v9 = vld [vmem:[%s1602_s3 + $0x20] sm:$0xff] (!%p192_p9)  ;;  %v466_v10 = vld [vmem:[%s1602_s3 + $0x28] sm:$0xff] (!%p192_p9)  ;;  %v467_v16 = vld [vmem:[%s1602_s3 + $0x30] sm:$0xff] (!%p192_p9)  ;;  %s1251_s12 = smov (!%p192_p9), [#allocation2]  }
  0x10   : > { %1031 = vmatprep.subr.bf16.mxu0 (!%p192_p9), %v1030_v3  ;;  %v1042_v14 = vpack.c.bf16 (!%p192_p9), %v466_v10, %v465_v9  ;;  %v468_v17 = vld [vmem:[%s1602_s3 + $0x38] sm:$0xff] (!%p192_p9)  ;;  %v469_v21 = vld [vmem:[%s1602_s3 + $0x40] sm:$0xff] (!%p192_p9)  ;;  %v470_v22 = vld [vmem:[%s1602_s3 + $0x48] sm:$0xff] (!%p192_p9)  ;;  %s1191_s13 = sshll.u32 (!%p192_p9), %s1251_s12, 4  ;;  %s1192_s13 = int_to_ptr.vmem [resolvable:$false] %s1191_s13 }
  0x11   : > { %1033 = vmatpush3.bf16.msra.mxu0 (!%p192_p9), %v1030_v3  ;;  %1066 = vmatprep.subr.bf16.mxu1 (!%p192_p9), %v1034_v7  ;;  %v1046_v19 = vpack.c.bf16 (!%p192_p9), %v468_v17, %v467_v16  ;;  %v1050_v24 = vpack.c.bf16 (!%p192_p9), %v470_v22, %v469_v21  ;;  %v471_v26 = vld [vmem:[%s1602_s3 + $0x50] sm:$0xff] (!%p192_p9)  ;;  %v472_v27 = vld [vmem:[%s1602_s3 + $0x58] sm:$0xff] (!%p192_p9)  ;;  %v473_v31 = vld [vmem:[%s1602_s3 + $0x60] sm:$0xff] (!%p192_p9)  ;;  %s1193_s14 = scalar_lea.vmem (!%p192_p9), %s1192_s13, 4096 }
  0x12   : > { %1035 = vmatprep.subr.bf16.mxu0 (!%p192_p9), %v1034_v7  ;;  %1074 = vmatpush3.bf16.msra.mxu1 (!%p192_p9), %v1034_v7  ;;  %v1054_v29 = vpack.c.bf16 (!%p192_p9), %v472_v27, %v471_v26  ;;  %v474_v32 = vld [vmem:[%s1602_s3 + $0x68] sm:$0xff] (!%p192_p9)  ;;  %v475_v40 = vld [vmem:[%s1602_s3 + $0x70] sm:$0xff] (!%p192_p9)  ;;  %v476_v41 = vld [vmem:[%s1602_s3 + $0x78] sm:$0xff] (!%p192_p9) }
  0x13   : > { %1067 = vmatprep.subr.bf16.mxu1 (!%p192_p9), %v1038_v8  ;;  %v1058_v34 = vpack.c.bf16 (!%p192_p9), %v474_v32, %v473_v31  ;;  %v1062_v42 = vpack.c.bf16 (!%p192_p9), %v476_v41, %v475_v40  ;;  %v872_v43 = vld [vmem:[%s1601_s2] ss:$0 sm:$0xff] (!%p192_p9) }
  0x15   : > { %s1612_s9 = smov (!%p220_p10, %s870_s9), 31 }
  0x16   : > { %s871_s23 = sshll.u32 %s1612_s9, 3  ;;  %1075 = vmatpush3.bf16.msra.mxu1 %v1038_v8  ;;  %s1549_s9 = scalar_lea.hbm %s1604_s5, %s895_s6 }
  0x17   : > { %s1354_s30 = scalar_lea.vmem %s1599_s0, %s871_s23  ;;  %1068 = vmatprep.subr.bf16.mxu1 %v1042_v14  ;;  %s216_s23 = sand.u32 1, %s1241_s19  }
  0x18   : > { %v226_v11 = vld [vmem:[%s1354_s30] sm:$0xff]  ;;  %v227_v12 = vld [vmem:[%s1354_s30 + $0x8] sm:$0xff]  ;;  %v228_v13 = vld [vmem:[%s1354_s30 + $0x10] sm:$0xff]  ;;  %s869_s25 = sshll.u32 %s216_s23, 7  ;;  %s1558_s22 = scalar_lea.sflag [#allocation3], %s216_s23 }
  0x19   : > { %950 = vmatprep.mubr.msk.f32.mxu0 %vm251_vm0, %v226_v11  ;;  %v229_v15 = vld [vmem:[%s1354_s30 + $0x18] sm:$0xff]  ;;  %v230_v18 = vld [vmem:[%s1354_s30 + $0x20] sm:$0xff]  ;;  %v231_v20 = vld [vmem:[%s1354_s30 + $0x28] sm:$0xff]  ;;  %s1514_s26 = scalar_lea.vmem [#allocation2], %s869_s25 }
  0x1a   : > { %951 = vmatmul.mubr.msk.f32.vlgmr.msra.gmra.mrb[0].mxu0 %vm251_vm0, %v227_v12  ;;  %1076 = vmatpush3.bf16.msra.mxu1 %v1042_v14  ;;  %v232_v23 = vld [vmem:[%s1354_s30 + $0x30] sm:$0xff]  ;;  %v233_v25 = vld [vmem:[%s1354_s30 + $0x38] sm:$0xff]  ;;  %v234_v28 = vld [vmem:[%s1354_s30 + $0x40] sm:$0xff]  ;;  %s803_s7 = sshll.u32 %s1514_s26, 4  ;;  %s1551_s7 = int_to_ptr.vmem [resolvable:$true] %s803_s7 }
  0x1b   : > { %953 = vmatprep.mubr.msk.f32.mxu0 %vm251_vm0, %v228_v13  ;;  %1037 = vmatpush3.bf16.msra.mxu0 %v1034_v7  ;;  %v235_v30 = vld [vmem:[%s1354_s30 + $0x48] sm:$0xff]  ;;  %v236_v33 = vld [vmem:[%s1354_s30 + $0x50] sm:$0xff]  ;;  %v237_v35 = vld [vmem:[%s1354_s30 + $0x58] sm:$0xff]  ;;  %s1187_s11 = scalar_lea.vmem %s1551_s7, 2048  ;;  %p1194_p0 = scmp.lt.s32.totalorder %s1551_s7, %s1192_s13 }
  0x1c   : > { %1039 = vmatprep.subr.bf16.mxu0 %v1038_v8  ;;  %1069 = vmatprep.subr.bf16.mxu1 %v1046_v19  ;;  %v238_v36 = vld [vmem:[%s1354_s30 + $0x60] sm:$0xff]  ;;  %v239_v37 = vld [vmem:[%s1354_s30 + $0x68] sm:$0xff]  ;;  %v240_v38 = vld [vmem:[%s1354_s30 + $0x70] sm:$0xff]  ;;  %p1188_p11 = scmp.ne.s32.totalorder %s1551_s7, %s1187_s11  ;;  %p1195_p1 = scmp.lt.s32.totalorder %s1193_s14, %s1187_s11 }
  0x1d   : > { %v241_v39 = vld [vmem:[%s1354_s30 + $0x78] sm:$0xff] }
  0x1e   : > { %954 = vmatmul.mubr.msk.f32.gmra.mrb[2].mxu0 %vm251_vm0, %v229_v15  ;;  %1077 = vmatpush3.bf16.msra.mxu1 %v1046_v19  ;;  %p1189_p12 = pnand %p1188_p11, %p1322_p5  ;;  %p1196_p2 = por %p1195_p1, %p1194_p0 }
  0x1f   : > { %956 = vmatprep.mubr.msk.f32.mxu0 %vm251_vm0, %v230_v18  ;;  %1041 = vmatpush3.bf16.msra.mxu0 %v1038_v8 }
  0x20   : > { %1043 = vmatprep.subr.bf16.mxu0 %v1042_v14  ;;  %1070 = vmatprep.subr.bf16.mxu1 %v1050_v24  ;;  %p1190_p13 = pneg %p1189_p12 }
  0x22   : > { %957 = vmatmul.mubr.msk.f32.gmra.mrb[4].mxu0 %vm251_vm0, %v231_v20  ;;  %1078 = vmatpush3.bf16.msra.mxu1 %v1050_v24  ;;  %p1197_p3 = pnand %p1196_p2, %p1190_p13 }
  0x23   : > { %959 = vmatprep.mubr.msk.f32.mxu0 %vm251_vm0, %v232_v23  ;;  %1045 = vmatpush3.bf16.msra.mxu0 %v1042_v14 }
  0x24   : > { %1047 = vmatprep.subr.bf16.mxu0 %v1046_v19  ;;  %1071 = vmatprep.subr.bf16.mxu1 %v1054_v29 }
  0x26   : > { %960 = vmatmul.mubr.msk.f32.gmra.mrb[6].mxu0 %vm251_vm0, %v233_v25  ;;  %1079 = vmatpush3.bf16.msra.mxu1 %v1054_v29 }
  0x27   : > { %962 = vmatprep.mubr.msk.f32.mxu0 %vm251_vm0, %v234_v28  ;;  %1049 = vmatpush3.bf16.msra.mxu0 %v1046_v19  ;;  %v889_v28 = vld [vmem:[%s1603_s4] ss:$0 sm:$0xff] }
  0x28   : > { %1051 = vmatprep.subr.bf16.mxu0 %v1050_v24  ;;  %1072 = vmatprep.subr.bf16.mxu1 %v1058_v34 }
  0x2a   : > { %963 = vmatmul.mubr.msk.f32.gmra.mrb[8].mxu0 %vm251_vm0, %v235_v30  ;;  %1080 = vmatpush3.bf16.msra.mxu1 %v1058_v34 }
  0x2b   : > { %965 = vmatprep.mubr.msk.f32.mxu0 %vm251_vm0, %v236_v33  ;;  %1053 = vmatpush3.bf16.msra.mxu0 %v1050_v24 }
  0x2c   : > { %1055 = vmatprep.subr.bf16.mxu0 %v1054_v29  ;;  %1073 = vmatprep.subr.bf16.mxu1 %v1062_v42 }
  0x2e   : > { %966 = vmatmul.mubr.msk.f32.gmra.mrb[10].mxu0 %vm251_vm0, %v237_v35  ;;  %1081 = vmatpush3.bf16.msra.mxu1 %v1062_v42 }
  0x2f   : > { %968 = vmatprep.mubr.msk.f32.mxu0 %vm251_vm0, %v238_v36  ;;  %1057 = vmatpush3.bf16.msra.mxu0 %v1054_v29 }
  0x30   : > { %1059 = vmatprep.subr.bf16.mxu0 %v1058_v34 }
  0x32   : > { %969 = vmatmul.mubr.msk.f32.gmra.mrb[12].mxu0 %vm251_vm0, %v239_v37 }
  0x33   : > { %971 = vmatprep.mubr.msk.f32.mxu0 %vm251_vm0, %v240_v38  ;;  %1061 = vmatpush3.bf16.msra.mxu0 %v1058_v34 }
  0x34   : > { %1063 = vmatprep.subr.bf16.mxu0 %v1062_v42 }
  0x36   : > { %972 = vmatmul.mubr.msk.f32.gmra.mrb[14].mxu0 %vm251_vm0, %v241_v39 }
  0x37   : > { %1065 = vmatpush3.bf16.msra.mxu0 %v1062_v42 }
  0xed   : > { %v952_v44 = vpop.f32.mrb[0].mxu0 }
  0xee   : > { %v372_v45 = vadd.f32 %v952_v44, %v872_v43  ;;  %v366_v46 = vpop.f32.mrb[1].mxu0 }
  0xef   : > { %v367_v47 = vadd.f32 %v872_v43, %v366_v46 }
  0xf0   : > { %v446_v50 = vmax.f32 %v372_v45, 0.0 }
  0xf1   : > { %v445_v48 = vmax.f32 %v367_v47, 0.0  ;;  %v955_v49 = vpop.f32.mrb[2].mxu0 }
  0xf2   : > { %v382_v51 = vadd.f32 %v955_v49, %v872_v43  ;;  %v376_v52 = vpop.f32.mrb[3].mxu0 }
  0xf3   : > { %v377_v53 = vadd.f32 %v872_v43, %v376_v52  ;;  %1006 = vmatprep.mubr.f32.mxu0 %v445_v48 }
  0xf4   : > { %1007 = vmatmul.mubr.f32.vlgmr.msra.gmra.mrb[16].mxu0 %v446_v50  ;;  %v448_v56 = vmax.f32 %v382_v51, 0.0 }
  0xf5   : > { %v447_v54 = vmax.f32 %v377_v53, 0.0  ;;  %v958_v55 = vpop.f32.mrb[4].mxu0 }
  0xf6   : > { %v392_v57 = vadd.f32 %v958_v55, %v872_v43  ;;  %v386_v58 = vpop.f32.mrb[5].mxu0 }
  0xf7   : > { %v387_v59 = vadd.f32 %v872_v43, %v386_v58  ;;  %1009 = vmatprep.mubr.f32.mxu0 %v447_v54 }
  0xf8   : > { %v450_v60 = vmax.f32 %v392_v57, 0.0  ;;  %1010 = vmatmul.mubr.f32.gmra.mrb[18].mxu0 %v448_v56 }
  0xf9   : > { %v449_v61 = vmax.f32 %v387_v59, 0.0  ;;  %v961_v62 = vpop.f32.mrb[6].mxu0 }
  0xfa   : > { %v402_v63 = vadd.f32 %v961_v62, %v872_v43  ;;  %v396_v0 = vpop.f32.mrb[7].mxu0 }
  0xfb   : > { %1012 = vmatprep.mubr.f32.mxu0 %v449_v61  ;;  %v397_v1 = vadd.f32 %v872_v43, %v396_v0 }
  0xfc   : > { %v452_v2 = vmax.f32 %v402_v63, 0.0  ;;  %1013 = vmatmul.mubr.f32.gmra.mrb[20].mxu0 %v450_v60 }
  0xfd   : > { %v964_v3 = vpop.f32.mrb[8].mxu0  ;;  %v451_v4 = vmax.f32 %v397_v1, 0.0 }
  0xfe   : > { %v412_v5 = vadd.f32 %v964_v3, %v872_v43  ;;  %v406_v6 = vpop.f32.mrb[9].mxu0 }
  0xff   : > { %v407_v7 = vadd.f32 %v872_v43, %v406_v6  ;;  %1015 = vmatprep.mubr.f32.mxu1 %v451_v4 }
 0x100   : > { %v454_v8 = vmax.f32 %v412_v5, 0.0  ;;  %1016 = vmatmul.mubr.f32.vlgmr.msra.gmra.mrb[0].mxu1 %v452_v2 }
 0x101   : > { %v453_v9 = vmax.f32 %v407_v7, 0.0  ;;  %v967_v10 = vpop.f32.mrb[10].mxu0 }
 0x102   : > { %v422_v11 = vadd.f32 %v967_v10, %v872_v43  ;;  %v416_v12 = vpop.f32.mrb[11].mxu0 }
 0x103   : > { %v417_v13 = vadd.f32 %v872_v43, %v416_v12  ;;  %1018 = vmatprep.mubr.f32.mxu1 %v453_v9 }
 0x104   : > { %v456_v14 = vmax.f32 %v422_v11, 0.0  ;;  %1019 = vmatmul.mubr.f32.gmra.mrb[2].mxu1 %v454_v8 }
 0x105   : > { %v455_v15 = vmax.f32 %v417_v13, 0.0  ;;  %v970_v16 = vpop.f32.mrb[12].mxu0 }
 0x106   : > { %v432_v17 = vadd.f32 %v970_v16, %v872_v43  ;;  %v426_v18 = vpop.f32.mrb[13].mxu0 }
 0x107   : > { %v427_v19 = vadd.f32 %v872_v43, %v426_v18  ;;  %1021 = vmatprep.mubr.f32.mxu1 %v455_v15 }
 0x108   : > { %v458_v20 = vmax.f32 %v432_v17, 0.0  ;;  %1022 = vmatmul.mubr.f32.gmra.mrb[4].mxu1 %v456_v14 }
 0x109   : > { %v457_v21 = vmax.f32 %v427_v19, 0.0  ;;  %v973_v22 = vpop.f32.mrb[14].mxu0 }
 0x10a   : > { %v442_v23 = vadd.f32 %v973_v22, %v872_v43  ;;  %v436_v24 = vpop.f32.mrb[15].mxu0 }
 0x10b   : > { %v437_v25 = vadd.f32 %v872_v43, %v436_v24  ;;  %1024 = vmatprep.mubr.f32.mxu1 %v457_v21 }
 0x10c   : > { %v460_v26 = vmax.f32 %v442_v23, 0.0  ;;  %1025 = vmatmul.mubr.f32.gmra.mrb[6].mxu1 %v458_v20 }
 0x10d   : > { %v459_v27 = vmax.f32 %v437_v25, 0.0 }
 0x10f   : > { %1027 = vmatprep.mubr.f32.mxu1 %v459_v27 }
 0x110   : > { %1028 = vmatmul.mubr.f32.gmra.mrb[8].mxu1 %v460_v26 }
 0x1c7   : > { %v1008_v29 = vpop.f32.mrb[16].mxu0 }
 0x1c8   : > { %v556_v30 = vadd.f32 %v1008_v29, %v889_v28  ;;  %v550_v31 = vpop.f32.mrb[17].mxu0 }
 0x1c9   : > { %v551_v33 = vadd.f32 %v889_v28, %v550_v31 }
 0x1ca   : > { %631 = vmax.xlane.f32.xlu0 %v556_v30 }
 0x1cb   : > { %v1011_v32 = vpop.f32.mrb[18].mxu0 }
 0x1cc   : > { %v566_v34 = vadd.f32 %v1011_v32, %v889_v28  ;;  %v560_v35 = vpop.f32.mrb[19].mxu0 }
 0x1cd   : > { %v561_v37 = vadd.f32 %v889_v28, %v560_v35 }
 0x1ce   : > { %635 = vmax.xlane.f32.xlu1 %v566_v34  ;;  %629 = vmax.xlane.f32.xlu0 %v551_v33 }
 0x1cf   : > { %v1014_v36 = vpop.f32.mrb[20].mxu0 }
 0x1d0   : > { %v570_v38 = vpop.f32.mrb[21].mxu0  ;;  %v576_v41 = vadd.f32 %v1014_v36, %v889_v28 }
 0x1d1   : > { %v571_v39 = vadd.f32 %v889_v28, %v570_v38 }
 0x1d2   : > { %633 = vmax.xlane.f32.xlu1 %v561_v37 }
 0x1d3   : > { %v1017_v40 = vpop.f32.mrb[0].mxu1  ;;  %637 = vmax.xlane.f32.xlu0 %v571_v39 }
 0x1d4   : > { %v580_v42 = vpop.f32.mrb[1].mxu1  ;;  %v586_v45 = vadd.f32 %v1017_v40, %v889_v28 }
 0x1d5   : > { %v581_v43 = vadd.f32 %v889_v28, %v580_v42 }
 0x1d6   : > { %639 = vmax.xlane.f32.xlu1 %v576_v41 }
 0x1d7   : > { %v1020_v44 = vpop.f32.mrb[2].mxu1  ;;  %641 = vmax.xlane.f32.xlu0 %v581_v43 }
 0x1d8   : > { %v590_v46 = vpop.f32.mrb[3].mxu1  ;;  %v1433_v49 = vadd.f32 %v1020_v44, %v889_v28 }
 0x1d9   : > { %v1430_v47 = vadd.f32 %v889_v28, %v590_v46 }
 0x1da   : > { %643 = vmax.xlane.f32.xlu1 %v586_v45 }
 0x1db   : > { %v1023_v48 = vpop.f32.mrb[4].mxu1  ;;  %645 = vmax.xlane.f32.xlu0 %v1430_v47 }
 0x1dc   : > { %v600_v50 = vpop.f32.mrb[5].mxu1  ;;  %v1439_v53 = vadd.f32 %v1023_v48, %v889_v28 }
 0x1dd   : > { %v1435_v51 = vadd.f32 %v889_v28, %v600_v50 }
 0x1de   : > { %647 = vmax.xlane.f32.xlu1 %v1433_v49 }
 0x1df   : > { %v1026_v52 = vpop.f32.mrb[6].mxu1  ;;  %649 = vmax.xlane.f32.xlu0 %v1435_v51 }
 0x1e0   : > { %v610_v54 = vpop.f32.mrb[7].mxu1  ;;  %v1445_v57 = vadd.f32 %v1026_v52, %v889_v28 }
 0x1e1   : > { %v1441_v55 = vadd.f32 %v889_v28, %v610_v54 }
 0x1e2   : > { %651 = vmax.xlane.f32.xlu1 %v1439_v53 }
 0x1e3   : > { %v1029_v56 = vpop.f32.mrb[8].mxu1  ;;  %653 = vmax.xlane.f32.xlu0 %v1441_v55 }
 0x1e4   : > { %v620_v58 = vpop.f32.mrb[9].mxu1  ;;  %v1451_v60 = vadd.f32 %v1029_v56, %v889_v28 }
 0x1e5   : > { %v1447_v59 = vadd.f32 %v889_v28, %v620_v58 }
 0x1e6   : > { %655 = vmax.xlane.f32.xlu1 %v1445_v57 }
 0x1e7   : > { %657 = vmax.xlane.f32.xlu0 %v1447_v59 }
 0x1ea   : > { %659 = vmax.xlane.f32.xlu1 %v1451_v60 }
 0x257   : > { %v632_v61 = vpop.xlane.xlu0 %631 }
 0x258   : > { %v662_v62 = vsub.f32 %v556_v30, %v632_v61 }
 0x25a   : > { %v679_v63 = vmul.f32 1.442695, %v662_v62 }
 0x25b   : > { %v636_v0 = vpop.xlane.xlu1 %635  ;;  %v630_v1 = vpop.xlane.xlu0 %629 }
 0x25c   : > { %1123 = vpow2.f32 %v679_v63  ;;  %v664_v2 = vsub.f32 %v566_v34, %v636_v0  ;;  %v661_v3 = vsub.f32 %v551_v33, %v630_v1 }
 0x25e   : > { %v683_v4 = vmul.f32 1.442695, %v664_v2  ;;  %v677_v5 = vmul.f32 1.442695, %v661_v3 }
 0x25f   : > { %v634_v6 = vpop.xlane.xlu1 %633 }
 0x260   : > { %1125 = vpow2.f32 %v683_v4  ;;  %v663_v7 = vsub.f32 %v561_v37, %v634_v6  ;;  %v638_v8 = vpop.xlane.xlu0 %637 }
 0x261   : > { %1127 = vpow2.f32 %v677_v5  ;;  %v665_v9 = vsub.f32 %v571_v39, %v638_v8 }
 0x262   : > { %v681_v10 = vmul.f32 1.442695, %v663_v7 }
 0x263   : > { %v640_v11 = vpop.xlane.xlu1 %639  ;;  %v685_v14 = vmul.f32 1.442695, %v665_v9 }
 0x264   : > { %1129 = vpow2.f32 %v681_v10  ;;  %v666_v12 = vsub.f32 %v576_v41, %v640_v11  ;;  %v642_v13 = vpop.xlane.xlu0 %641 }
 0x265   : > { %v667_v15 = vsub.f32 %v581_v43, %v642_v13 }
 0x266   : > { %v1454_v16 = vpop.eup %1123  ;;  %v687_v17 = vmul.f32 1.442695, %v666_v12 }
 0x267   : > { %711 = vadd.xlane.f32.xlu1 %v1454_v16  ;;  %v644_v18 = vpop.xlane.xlu1 %643  ;;  %v689_v21 = vmul.f32 1.442695, %v667_v15 }
 0x268   : > { %1131 = vpow2.f32 %v687_v17  ;;  %v668_v19 = vsub.f32 %v586_v45, %v644_v18  ;;  %v646_v20 = vpop.xlane.xlu0 %645 }
 0x269   : > { %1133 = vpow2.f32 %v685_v14  ;;  %v669_v22 = vsub.f32 %v1430_v47, %v646_v20 }
 0x26a   : > { %v1458_v23 = vpop.eup %1125  ;;  %v691_v24 = vmul.f32 1.442695, %v668_v19 }
 0x26b   : > { %v1460_v25 = vpop.eup %1127  ;;  %715 = vadd.xlane.f32.xlu1 %v1458_v23  ;;  %v648_v26 = vpop.xlane.xlu1 %647  ;;  %v693_v29 = vmul.f32 1.442695, %v669_v22 }
 0x26c   : > { %1135 = vpow2.f32 %v691_v24  ;;  %v670_v27 = vsub.f32 %v1433_v49, %v648_v26  ;;  %709 = vadd.xlane.f32.xlu0 %v1460_v25  ;;  %v650_v28 = vpop.xlane.xlu0 %649 }
 0x26d   : > { %1137 = vpow2.f32 %v689_v21  ;;  %v671_v30 = vsub.f32 %v1435_v51, %v650_v28 }
 0x26e   : > { %v1466_v31 = vpop.eup %1129  ;;  %v695_v32 = vmul.f32 1.442695, %v670_v27 }
 0x26f   : > { %v652_v33 = vpop.xlane.xlu1 %651  ;;  %v697_v36 = vmul.f32 1.442695, %v671_v30 }
 0x270   : > { %1139 = vpow2.f32 %v695_v32  ;;  %v672_v34 = vsub.f32 %v1439_v53, %v652_v33  ;;  %713 = vadd.xlane.f32.xlu0 %v1466_v31  ;;  %v654_v35 = vpop.xlane.xlu0 %653 }
 0x271   : > { %1141 = vpow2.f32 %v693_v29  ;;  %v673_v37 = vsub.f32 %v1441_v55, %v654_v35 }
 0x272   : > { %v1471_v38 = vpop.eup %1131  ;;  %v699_v39 = vmul.f32 1.442695, %v672_v34 }
 0x273   : > { %v1473_v40 = vpop.eup %1133  ;;  %719 = vadd.xlane.f32.xlu1 %v1471_v38  ;;  %v656_v41 = vpop.xlane.xlu1 %655  ;;  %v701_v44 = vmul.f32 1.442695, %v673_v37 }
 0x274   : > { %1143 = vpow2.f32 %v699_v39  ;;  %v674_v42 = vsub.f32 %v1445_v57, %v656_v41  ;;  %717 = vadd.xlane.f32.xlu0 %v1473_v40  ;;  %v658_v43 = vpop.xlane.xlu0 %657 }
 0x275   : > { %1145 = vpow2.f32 %v697_v36  ;;  %v675_v45 = vsub.f32 %v1447_v59, %v658_v43 }
 0x276   : > { %v1479_v46 = vpop.eup %1135  ;;  %v703_v47 = vmul.f32 1.442695, %v674_v42 }
 0x277   : > { %v1481_v48 = vpop.eup %1137  ;;  %723 = vadd.xlane.f32.xlu1 %v1479_v46  ;;  %v660_v49 = vpop.xlane.xlu1 %659  ;;  %v705_v51 = vmul.f32 1.442695, %v675_v45 }
 0x278   : > { %1147 = vpow2.f32 %v703_v47  ;;  %v676_v50 = vsub.f32 %v1451_v60, %v660_v49  ;;  %721 = vadd.xlane.f32.xlu0 %v1481_v48 }
 0x279   : > { %1149 = vpow2.f32 %v701_v44 }
 0x27a   : > { %v1486_v52 = vpop.eup %1139  ;;  %v707_v53 = vmul.f32 1.442695, %v676_v50 }
 0x27b   : > { %v1488_v54 = vpop.eup %1141  ;;  %727 = vadd.xlane.f32.xlu1 %v1486_v52 }
 0x27c   : > { %1151 = vpow2.f32 %v707_v53  ;;  %725 = vadd.xlane.f32.xlu0 %v1488_v54 }
 0x27d   : > { %1153 = vpow2.f32 %v705_v51 }
 0x27e   : > { %v1492_v55 = vpop.eup %1143 }
 0x27f   : > { %v1494_v56 = vpop.eup %1145  ;;  %731 = vadd.xlane.f32.xlu1 %v1492_v55 }
 0x280   : > { %729 = vadd.xlane.f32.xlu0 %v1494_v56 }
 0x282   : > { %v1498_v57 = vpop.eup %1147 }
 0x283   : > { %v1500_v58 = vpop.eup %1149  ;;  %735 = vadd.xlane.f32.xlu1 %v1498_v57 }
 0x284   : > { %733 = vadd.xlane.f32.xlu0 %v1500_v58 }
 0x286   : > { %v1504_v59 = vpop.eup %1151 }
 0x287   : > { %v1506_v60 = vpop.eup %1153  ;;  %739 = vadd.xlane.f32.xlu1 %v1504_v59 }
 0x288   : > { %737 = vadd.xlane.f32.xlu0 %v1506_v60 }
 0x2f4   : > { %v712_v61 = vpop.xlane.xlu1 %711 }
 0x2f5   : > { %1155 = vrcp.f32 %v712_v61 }
 0x2f8   : > { %v716_v62 = vpop.xlane.xlu1 %715 }
 0x2f9   : > { %1157 = vrcp.f32 %v716_v62  ;;  %v710_v63 = vpop.xlane.xlu0 %709 }
 0x2fa   : > { %1159 = vrcp.f32 %v710_v63 }
 0x2fd   : > { %v714_v0 = vpop.xlane.xlu0 %713 }
 0x2fe   : > { %1161 = vrcp.f32 %v714_v0 }
 0x2ff   : > { %v1156_v1 = vpop.eup %1155 }
 0x300   : > { %v758_v2 = vmul.f32 %v1156_v1, %v1454_v16  ;;  %v720_v3 = vpop.xlane.xlu1 %719 }
 0x301   : > { %1163 = vrcp.f32 %v720_v3  ;;  %v718_v4 = vpop.xlane.xlu0 %717 }
 0x302   : > { %774 = vst [vmem:[%s1514_s26 + $0x8] sm:$0xff] %v758_v2  ;;  %1165 = vrcp.f32 %v718_v4 }
 0x303   : > { %v1158_v5 = vpop.eup %1157 }
 0x304   : > { %v1160_v6 = vpop.eup %1159  ;;  %v760_v7 = vmul.f32 %v1158_v5, %v1458_v23  ;;  %v724_v8 = vpop.xlane.xlu1 %723 }
 0x305   : > { %v757_v9 = vmul.f32 %v1160_v6, %v1460_v25  ;;  %1167 = vrcp.f32 %v724_v8  ;;  %v722_v10 = vpop.xlane.xlu0 %721 }
 0x306   : > { %776 = vst [vmem:[%s1514_s26 + $0x18] sm:$0xff] %v760_v7  ;;  %1169 = vrcp.f32 %v722_v10 }
 0x307   : > { %773 = vst [vmem:[%s1514_s26] sm:$0xff] %v757_v9 }
 0x308   : > { %v1162_v11 = vpop.eup %1161  ;;  %v728_v12 = vpop.xlane.xlu1 %727 }
 0x309   : > { %v759_v13 = vmul.f32 %v1162_v11, %v1466_v31  ;;  %1171 = vrcp.f32 %v728_v12  ;;  %v726_v14 = vpop.xlane.xlu0 %725 }
 0x30a   : > { %1173 = vrcp.f32 %v726_v14 }
 0x30b   : > { %v1164_v15 = vpop.eup %1163  ;;  %775 = vst [vmem:[%s1514_s26 + $0x10] sm:$0xff] %v759_v13 }
 0x30c   : > { %v1166_v16 = vpop.eup %1165  ;;  %v762_v17 = vmul.f32 %v1164_v15, %v1471_v38  ;;  %v732_v18 = vpop.xlane.xlu1 %731 }
 0x30d   : > { %v761_v19 = vmul.f32 %v1166_v16, %v1473_v40  ;;  %1175 = vrcp.f32 %v732_v18  ;;  %v730_v20 = vpop.xlane.xlu0 %729 }
 0x30e   : > { %778 = vst [vmem:[%s1514_s26 + $0x28] sm:$0xff] %v762_v17  ;;  %1177 = vrcp.f32 %v730_v20 }
 0x30f   : > { %v1168_v21 = vpop.eup %1167  ;;  %777 = vst [vmem:[%s1514_s26 + $0x20] sm:$0xff] %v761_v19 }
 0x310   : > { %v1170_v22 = vpop.eup %1169  ;;  %v764_v23 = vmul.f32 %v1168_v21, %v1479_v46  ;;  %v736_v24 = vpop.xlane.xlu1 %735 }
 0x311   : > { %v763_v25 = vmul.f32 %v1170_v22, %v1481_v48  ;;  %1179 = vrcp.f32 %v736_v24  ;;  %v734_v26 = vpop.xlane.xlu0 %733 }
 0x312   : > { %780 = vst [vmem:[%s1514_s26 + $0x38] sm:$0xff] %v764_v23  ;;  %1181 = vrcp.f32 %v734_v26 }
 0x313   : > { %v1172_v27 = vpop.eup %1171  ;;  %779 = vst [vmem:[%s1514_s26 + $0x30] sm:$0xff] %v763_v25 }
 0x314   : > { %v1174_v28 = vpop.eup %1173  ;;  %v766_v29 = vmul.f32 %v1172_v27, %v1486_v52  ;;  %v740_v30 = vpop.xlane.xlu1 %739 }
 0x315   : > { %v765_v31 = vmul.f32 %v1174_v28, %v1488_v54  ;;  %1183 = vrcp.f32 %v740_v30  ;;  %v738_v32 = vpop.xlane.xlu0 %737 }
 0x316   : > { %782 = vst [vmem:[%s1514_s26 + $0x48] sm:$0xff] %v766_v29  ;;  %1185 = vrcp.f32 %v738_v32 }
 0x317   : > { %v1176_v33 = vpop.eup %1175  ;;  %781 = vst [vmem:[%s1514_s26 + $0x40] sm:$0xff] %v765_v31 }
 0x318   : > { %v1178_v34 = vpop.eup %1177  ;;  %v768_v35 = vmul.f32 %v1176_v33, %v1492_v55 }
 0x319   : > { %v767_v36 = vmul.f32 %v1178_v34, %v1494_v56 }
 0x31a   : > { %784 = vst [vmem:[%s1514_s26 + $0x58] sm:$0xff] %v768_v35 }
 0x31b   : > { %v1180_v37 = vpop.eup %1179  ;;  %783 = vst [vmem:[%s1514_s26 + $0x50] sm:$0xff] %v767_v36 }
 0x31c   : > { %v1182_v38 = vpop.eup %1181  ;;  %v770_v39 = vmul.f32 %v1180_v37, %v1498_v57 }
 0x31d   : > { %v769_v40 = vmul.f32 %v1182_v38, %v1500_v58 }
 0x31e   : > { %786 = vst [vmem:[%s1514_s26 + $0x68] sm:$0xff] %v770_v39 }
 0x31f   : > { %v1184_v41 = vpop.eup %1183  ;;  %785 = vst [vmem:[%s1514_s26 + $0x60] sm:$0xff] %v769_v40 }
 0x320   : > { %v1186_v42 = vpop.eup %1185  ;;  %v772_v43 = vmul.f32 %v1184_v41, %v1504_v59 }
 0x321   : > { %v771_v44 = vmul.f32 %v1186_v42, %v1506_v60 }
 0x322   : > { %788 = vst [vmem:[%s1514_s26 + $0x78] sm:$0xff] %v772_v43 }
 0x323   : > { %787 = vst [vmem:[%s1514_s26 + $0x70] sm:$0xff] %v771_v44 }
 0x324   : > { %1200 = shalt.err (!%p1197_p3)
}
 0x325   : > { %s1201_s15 = scalar_lea.hbm %s1549_s9, 2048  ;;  %s1205_s17 = scalar_lea.hbm %s1604_s5, 4096 }
 0x326   : > { %p1202_p4 = scmp.ne.s32.totalorder %s1549_s9, %s1201_s15  ;;  %p1206_p9 = scmp.lt.u32.totalorder %s1549_s9, %s1604_s5 }
 0x327   : > { %p1207_p10 = scmp.lt.u32.totalorder %s1205_s17, %s1201_s15  ;;  %p1209_p12 = scmp.lt.u32.totalorder %s1201_s15, %s1549_s9 }
 0x328   : > { %p1203_p7 = pnand %p1202_p4, %p1322_p5 }
 0x329   : > { %p1208_p11 = por %p1207_p10, %p1206_p9 }
 0x32a   : > { %p1204_p8 = pneg %p1203_p7 }
 0x32b   : > { %p1210_p13 = por %p1209_p12, %p1208_p11 }
 0x32d   : > { %p1211_p0 = pnand %p1210_p13, %p1204_p8 }
 0x32f   : > { %1214 = shalt.err (!%p1211_p0)
}
 0x330   : > { %s1252_s26 = smov 128   ;;  %s1253_s6 = smov 8  }
 0x331   : > { %1082 = dma.vmem_to_hbm [thread:$0]  (%p1322_p5), %s1551_s7, 2048, %s1549_s9, %s1558_s22, %s1252_s26, %s1252_s26, %s1253_s6  }
 0x332 PF: > { %p1088_p1 = scmp.ge.s32.totalorder %s1249_s21, 2  ;;  %s818_s8 = sand.u32 1, %s1237_s18  }
 0x333   : > { %s819_s10 = scalar_lea.sflag [#allocation3], %s818_s8 }
 0x334   : > { %p1085_p2 = pnand %p1088_p1, %p1326_p6 }
 0x336   : > { %1232 = dma.done.wait (!%p1085_p2), %s819_s10, 2048  }
 0x337   : > { %1234 = vsyncadd (!%p1085_p2), %s819_s10, 4294965248  ;;  %p15_p3 = scmp.ge.s32.totalorder %s1309_s24, 4   ;;  %s1607_s18 = smov %s1241_s19 }
 0x338   : > { %s1608_s19 = smov %s1245_s20  ;;  %s1609_s20 = smov %s1320_s27 }
 0x339   : > { %s1610_s21 = smov %s1309_s24  ;;  %17 = sbr.rel (!%p15_p3) target bundleno = 3 (0x3), region = 75 }
 0x340   :  { %824 = vsyncpa [#allocation3], 1 }
 0x341   :  { %826 = vsyncpa [#allocation3 + $0x1], 1 }

</bundles_post_ra>
